<compile_context>
chip_gen: v7x
topology: tpu7x:2x2x1
jax: 0.10.0
libtpu: 0.0.40
codegen_flags: <defaults>
</compile_context>

<pallas_src>
import functools

import jax
import jax.numpy as jnp
from jax import lax
from jax.experimental import pallas as pl
from jax.experimental.pallas import tpu as pltpu

_NUM_SHARDS = 2       # leading 'parallel' grid axis (both TCs on v7x)
_LANES = 128
_SUBLANES = 8


def _round_up(x, m):
    return (x + m - 1) // m * m


def _cdiv(a, b):
    return (a + b - 1) // b


def _cross_entropy_kernel(pred_ref, tgt_ref, out_ref, acc_ref, *, inv_n):
    """Process one (TM, C) tile of rows; accumulate scalar loss across axis 1."""
    k = pl.program_id(1)

    @pl.when(k == 0)
    def _init():
        acc_ref[...] = jnp.zeros_like(acc_ref)

    x = pred_ref[...].astype(jnp.float32)                     # (TM, C) f32 in vregs
    tgt = tgt_ref[...]                                        # (TM, 1) int32

    # Numerically stable log-softmax. The row_max shift cancels in
    #   per_sample = logsumexp(x) - x[target] = log(sum exp(shifted)) - shifted[target]
    row_max = jnp.max(x, axis=-1, keepdims=True)              # (TM, 1)
    shifted = x - row_max                                     # (TM, C)
    log_sum = jnp.log(jnp.sum(jnp.exp(shifted), axis=-1, keepdims=True))  # (TM, 1)

    classes = lax.broadcasted_iota(jnp.int32, x.shape, 1)     # (TM, C)
    tgt_shifted = jnp.sum(jnp.where(classes == tgt, shifted, 0.0),
                          axis=-1, keepdims=True)             # (TM, 1)

    per_sample = log_sum - tgt_shifted                        # (TM, 1)
    # rows padded in the wrapper carry target == -1 and must not contribute;
    # jnp.where is a select, so garbage (inf/nan) in masked rows cannot leak.
    per_sample = jnp.where(tgt >= 0, per_sample, 0.0)

    acc_ref[...] += jnp.sum(per_sample, keepdims=True)        # (1, 1) running sum

    @pl.when(k == pl.num_programs(1) - 1)
    def _finalize():
        # partial mean for this shard, written once, lane-dense (8, 128) tile
        out_ref[...] = jnp.broadcast_to(acc_ref[...] * inv_n, out_ref.shape)


def get_loss(pred, target, _unused=None):
    """Pallas equivalent of get_loss.forward(pred, target, _)."""
    pred = jnp.asarray(pred)                                  # keep native dtype (bf16 ok)
    tgt = jnp.reshape(jnp.asarray(target, jnp.int32), (-1,))  # target.view(-1)
    n, c = pred.shape
    assert tgt.shape[0] == n, "target.view(-1) must match pred batch dim"

    # --- tiling geometry --------------------------------------------------
    itemsize = jnp.dtype(pred.dtype).itemsize
    c_phys = _round_up(c, _LANES)     # physical lane footprint of one row in VMEM

    rows_per_shard = _cdiv(n, _NUM_SHARDS)
    # keep one (TM, C) tile near ~4 MiB so double-buffering fits v7x VMEM
    tm_cap = max(_SUBLANES, ((4 << 20) // (c_phys * itemsize)) // _SUBLANES * _SUBLANES)
    tm = max(_SUBLANES, min(1024, tm_cap, _round_up(rows_per_shard, _SUBLANES)))
    tiles = _cdiv(rows_per_shard, tm)
    n_pad = _NUM_SHARDS * tiles * tm

    # --- padding: rows only (class axis stays unpadded / lane-masked) -----
    if n_pad != n:
        pred = jnp.pad(pred, ((0, n_pad - n), (0, 0)))
        tgt = jnp.pad(tgt, (0, n_pad - n), constant_values=-1)
    tgt2d = tgt.reshape(n_pad, 1)

    inv_n = 1.0 / float(n)
    kernel = functools.partial(_cross_entropy_kernel, inv_n=inv_n)

    cost = pl.CostEstimate(
        flops=6 * n_pad * c,
        transcendentals=n_pad * c + n_pad,
        bytes_accessed=n_pad * c * itemsize + n_pad * 4
                       + _NUM_SHARDS * _SUBLANES * _LANES * 4,
    )

    out = pl.pallas_call(
        kernel,
        out_shape=jax.ShapeDtypeStruct((_NUM_SHARDS * _SUBLANES, _LANES), jnp.float32),
        grid_spec=pltpu.PrefetchScalarGridSpec(
            num_scalar_prefetch=0,
            grid=(_NUM_SHARDS, tiles),
            in_specs=[
                pl.BlockSpec((tm, c), lambda h, k: (h * tiles + k, 0)),
                pl.BlockSpec((tm, 1), lambda h, k: (h * tiles + k, 0)),
            ],
            out_specs=pl.BlockSpec((_SUBLANES, _LANES), lambda h, k: (h, 0)),
            scratch_shapes=[pltpu.VMEM((1, 1), jnp.float32)],
        ),
        compiler_params=pltpu.CompilerParams(
            dimension_semantics=("parallel", "arbitrary"),
        ),
        cost_estimate=cost,
    )(pred, tgt2d)

    # per-shard partial means live at out[h*8, 0]; sum them for the global mean
    return jnp.sum(out[0::_SUBLANES, 0])


if __name__ == "__main__":
    key = jax.random.PRNGKey(0)

    def _check(n, c, subkey):
        k_pred, k_tgt = jax.random.split(subkey)
        pred = jax.random.normal(k_pred, (n, c), dtype=jnp.float32)
        target = jax.random.randint(k_tgt, (n,), 0, c, dtype=jnp.int32)
        loss = get_loss(pred, target, None)
        jax.block_until_ready(loss)
        # reference: same math as torch.nn.CrossEntropyLoss
        logp = jax.nn.log_softmax(pred, axis=-1)
        ref = -jnp.mean(logp[jnp.arange(n), target])
        assert jnp.allclose(loss, ref, atol=1e-5, rtol=1e-5), (n, c, loss, ref)

    k1, k2 = jax.random.split(key)
    _check(10, 40, k1)   # ModelNet40-style class count; exercises row padding path
    _check(32, 40, k2)   # no-row-pad path (batch multiple of shard*TM coverage)

    print("KERNEL_OK")
</pallas_src>

<mosaic_0001>
module attributes {stable_mosaic.version = 11 : i64} {
  func.func @_cross_entropy_kernel(%arg0: i32, %arg1: i32, %arg2: memref<8x40xf32, #tpu.memory_space<vmem>>, %arg3: memref<8x1xi32, #tpu.memory_space<vmem>>, %arg4: memref<8x128xf32, #tpu.memory_space<vmem>>, %arg5: memref<1x1xf32, #tpu.memory_space<vmem>>) attributes {dimension_semantics = [#tpu.dimension_semantics<parallel>, #tpu.dimension_semantics<arbitrary>], iteration_bounds = array<i64: 2, 1>, scalar_prefetch = 0 : i64, scratch_operands = 1 : i64, tpu.core_type = #tpu.core_type<tc>, window_params = [{transform_indices = @transform_0, window_bounds = array<i64: 8, 40>}, {transform_indices = @transform_1, window_bounds = array<i64: 8, 1>}, {transform_indices = @transform_2, window_bounds = array<i64: 8, 128>}]} {
    %c0_i32 = arith.constant 0 : i32
    %0 = arith.cmpi eq, %arg1, %c0_i32 : i32
    %1 = arith.extui %0 : i1 to i32
    %c0_i32_0 = arith.constant 0 : i32
    %2 = arith.cmpi ne, %1, %c0_i32_0 : i32
    scf.if %2 {
      %cst_16 = arith.constant 0.000000e+00 : f32
      %36 = vector.broadcast %cst_16 : f32 to vector<1x1xf32>
      %c0_17 = arith.constant 0 : index
      %c0_18 = arith.constant 0 : index
      %37 = vector.load %arg5[%c0_17, %c0_18] : memref<1x1xf32, #tpu.memory_space<vmem>>, vector<1x1xf32>
      tpu.vector_store %arg5[%c0_17, %c0_18], %36 {strides = array<i32>} : memref<1x1xf32, #tpu.memory_space<vmem>>, vector<1x1xf32>,
    } else {
    }
    %c0 = arith.constant 0 : index
    %c0_1 = arith.constant 0 : index
    %3 = vector.load %arg2[%c0, %c0_1] : memref<8x40xf32, #tpu.memory_space<vmem>>, vector<8x40xf32>
    %c0_2 = arith.constant 0 : index
    %c0_3 = arith.constant 0 : index
    %4 = vector.load %arg3[%c0_2, %c0_3] : memref<8x1xi32, #tpu.memory_space<vmem>>, vector<8x1xi32>
    %cst = arith.constant dense<0xFF800000> : vector<8xf32>
    %5 = vector.multi_reduction <maximumf>, %3, %cst [1] : vector<8x40xf32> to vector<8xf32>
    %6 = vector.shape_cast %5 : vector<8xf32> to vector<8x1xf32>
    %7 = vector.broadcast %6 : vector<8x1xf32> to vector<8x40xf32>
    %8 = arith.subf %3, %7 : vector<8x40xf32>
    %9 = math.exp %8 : vector<8x40xf32>
    %cst_4 = arith.constant dense<0.000000e+00> : vector<8xf32>
    %10 = vector.multi_reduction <add>, %9, %cst_4 [1] : vector<8x40xf32> to vector<8xf32>
    %11 = vector.shape_cast %10 : vector<8xf32> to vector<8x1xf32>
    %12 = math.log %11 : vector<8x1xf32>
    %13 = tpu.iota {dimensions = array<i32: 1>} : vector<8x40xi32>
    %14 = vector.broadcast %4 : vector<8x1xi32> to vector<8x40xi32>
    %15 = arith.cmpi eq, %13, %14 : vector<8x40xi32>
    %cst_5 = arith.constant 0.000000e+00 : f32
    %16 = vector.broadcast %cst_5 : f32 to vector<8x40xf32>
    %17 = arith.select %15, %8, %16 : vector<8x40xi1>, vector<8x40xf32>
    %cst_6 = arith.constant dense<0.000000e+00> : vector<8xf32>
    %18 = vector.multi_reduction <add>, %17, %cst_6 [1] : vector<8x40xf32> to vector<8xf32>
    %19 = vector.shape_cast %18 : vector<8xf32> to vector<8x1xf32>
    %20 = arith.subf %12, %19 : vector<8x1xf32>
    %c0_i32_7 = arith.constant 0 : i32
    %21 = vector.broadcast %c0_i32_7 : i32 to vector<8x1xi32>
    %22 = arith.cmpi sge, %4, %21 : vector<8x1xi32>
    %cst_8 = arith.constant 0.000000e+00 : f32
    %23 = vector.broadcast %cst_8 : f32 to vector<8x1xf32>
    %24 = arith.select %22, %20, %23 : vector<8x1xi1>, vector<8x1xf32>
    %c0_9 = arith.constant 0 : index
    %c0_10 = arith.constant 0 : index
    %25 = vector.load %arg5[%c0_9, %c0_10] : memref<1x1xf32, #tpu.memory_space<vmem>>, vector<1x1xf32>
    %26 = vector.shape_cast %24 : vector<8x1xf32> to vector<1x8x1xf32>
    %cst_11 = arith.constant dense<0.000000e+00> : vector<1xf32>
    %27 = vector.multi_reduction <add>, %26, %cst_11 [1, 2] : vector<1x8x1xf32> to vector<1xf32>
    %28 = vector.shape_cast %27 : vector<1xf32> to vector<1x1x1xf32>
    %29 = vector.extract %28[0, 0, 0] : f32 from vector<1x1x1xf32>
    %30 = vector.broadcast %29 : f32 to vector<1x1xf32>
    %31 = arith.addf %25, %30 : vector<1x1xf32>
    %c0_12 = arith.constant 0 : index
    %c0_13 = arith.constant 0 : index
    %32 = vector.load %arg5[%c0_12, %c0_13] : memref<1x1xf32, #tpu.memory_space<vmem>>, vector<1x1xf32>
    tpu.vector_store %arg5[%c0_12, %c0_13], %31 {strides = array<i32>} : memref<1x1xf32, #tpu.memory_space<vmem>>, vector<1x1xf32>,
    %c0_i32_14 = arith.constant 0 : i32
    %33 = arith.cmpi eq, %arg1, %c0_i32_14 : i32
    %34 = arith.extui %33 : i1 to i32
    %c0_i32_15 = arith.constant 0 : i32
    %35 = arith.cmpi ne, %34, %c0_i32_15 : i32
    scf.if %35 {
      %c0_16 = arith.constant 0 : index
      %c0_17 = arith.constant 0 : index
      %36 = vector.load %arg5[%c0_16, %c0_17] : memref<1x1xf32, #tpu.memory_space<vmem>>, vector<1x1xf32>
      %cst_18 = arith.constant 1.000000e-01 : f32
      %37 = vector.broadcast %cst_18 : f32 to vector<1x1xf32>
      %38 = arith.mulf %36, %37 : vector<1x1xf32>
      %39 = vector.shape_cast %38 : vector<1x1xf32> to vector<1x1xf32>
      %40 = vector.broadcast %39 : vector<1x1xf32> to vector<8x128xf32>
      %c0_19 = arith.constant 0 : index
      %c0_20 = arith.constant 0 : index
      %41 = vector.load %arg4[%c0_19, %c0_20] : memref<8x128xf32, #tpu.memory_space<vmem>>, vector<8x128xf32>
      tpu.vector_store %arg4[%c0_19, %c0_20], %40 {strides = array<i32>} : memref<8x128xf32, #tpu.memory_space<vmem>>, vector<8x128xf32>,
    } else {
    }
    return
  }
  func.func @transform_0(%arg0: i32, %arg1: i32) -> (i32, i32) {
    %c1_i32 = arith.constant 1 : i32
    %0 = arith.muli %arg0, %c1_i32 : i32
    %1 = arith.addi %0, %arg1 : i32
    %c0_i32 = arith.constant 0 : i32
    %c0_i32_0 = arith.constant 0 : i32
    return %1, %c0_i32 : i32, i32
  }
  func.func @transform_1(%arg0: i32, %arg1: i32) -> (i32, i32) {
    %c1_i32 = arith.constant 1 : i32
    %0 = arith.muli %arg0, %c1_i32 : i32
    %1 = arith.addi %0, %arg1 : i32
    %c0_i32 = arith.constant 0 : i32
    %c0_i32_0 = arith.constant 0 : i32
    return %1, %c0_i32 : i32, i32
  }
  func.func @transform_2(%arg0: i32, %arg1: i32) -> (i32, i32) {
    %c0_i32 = arith.constant 0 : i32
    %c0_i32_0 = arith.constant 0 : i32
    return %arg0, %c0_i32 : i32, i32
  }
}

</mosaic_0001>

<bundles_post_ra>
// kernel: tpu_custom_call.1
= control target key start
LH: loop header
LB: loop body
LE: loop exit
PB: predicated region body
PF: predicated region fallthrough
CT: control target
= control target key end

     0   :  { %7 = vsyncpa [#allocation4], 0  ;;  %s632_s0 = inlined_call_operand.vmem [shape: f32[16,40], index: 0, kind: input, shape index: {}]   ;;  %s633_s1 = inlined_call_operand.vmem [shape: s32[16,1], index: 1, kind: input, shape index: {}]   ;;  %s634_s2 = inlined_call_operand.hbm [shape: f32[16,128], index: 2, kind: output, shape index: {}]  }
   0x1   :  { %9 = vsyncpa [#allocation4 + $0x1], 0  ;;  %s514_s9 = smov 0   ;;  %s516_s10 = smov 0  }
   0x2   :  { %s518_s11 = smov 0   ;;  %s520_s12 = smov 0  }
   0x3   :  { %s522_s13 = smov 0   ;;  %s524_s14 = smov 0  }
   0x4 LB: > { %s339_s15 = sadd.s32 4294967295, %s494_s14   ;;  %s340_s16 = sadd.s32 4294967294, %s494_s14   ;;  %s494_s14 = sphi %s524_s14, %s15_s14   ;;  %s490_s13 = sphi %s522_s13, %s641_s13   ;;  %s486_s12 = sphi %s520_s12, %s640_s12   ;;  %s482_s11 = sphi %s518_s11, %s639_s11   ;;  %s478_s10 = sphi %s516_s10, %s638_s10   ;;  %s474_s9 = sphi %s514_s9, %s637_s9  }
   0x5   : > { %s27_s17 = sadd.s32 1, %s490_s13  ;;  %s90_s18 = sadd.s32 1, %s482_s11 }
   0x6   : > { %p29_p0 = scmp.ge.s32.totalorder %s27_s17, 2  ;;  %p100_p1 = scmp.ne.s32.totalorder %s482_s11, %s478_s10 }
   0x7   : > { %p101_p2 = scmp.eq.s32.totalorder %s339_s15, 1  ;;  %p106_p3 = scmp.ne.s32.totalorder %s478_s10, %s474_s9 }
   0x8   : > { %s643_s17 = smov (%p29_p0, %s27_s17), 0  ;;  %p107_p5 = scmp.eq.s32.totalorder %s340_s16, 1 }
   0x9   : > { %p554_p4 = por %p101_p2, %p100_p1  ;;  %s87_s20 = ssub.s32 %s490_s13, %s643_s17 }
   0xa   : > { %p343_p6 = scmp.ge.s32.totalorder %s494_s14, 1  ;;  %p88_p7 = scmp.eq.s32.totalorder %s87_s20, 0 }
   0xb   : > { %p561_p8 = por %p107_p5, %p106_p3  ;;  %p143_p9 = scmp.lt.s32.totalorder %s494_s14, 3 }
   0xc   : > { %s567_s22 = scalar_select %p88_p7, %s482_s11, %s90_s18  }
   0xd   : > { %p144_p10 = pnand %p343_p6, %p143_p9 }
   0xe   : > { %p171_p11 = scmp.lt.s32.totalorder (!%p144_p10), %s486_s12, 1  ;;  %v496_v0 = vmov (!%p144_p10), 0   ;;  %vm190_vm0 = vcmask (!%p144_p10), 326656   ;;  %v202_v7 = vlaneseq (!%p144_p10)  ;;  %vm216_vm3 = vcmask (!%p144_p10), 7168   ;;  %s167_s4 = sand.u32 (!%p144_p10), 1, %s478_s10  }
   0xf   : > { %147 = sbr.rel (%p144_p10) target bundleno = 706 (0x2c2), region = 28  ;;  %410 = vset.pattern.permute.xlu0 (!%p144_p10), %v496_v0  ;;  %411 = vset.pattern.permute.xlu1 (!%p144_p10), %v496_v0  ;;  %vm186_vm4 = vcmask (!%p144_p10), 0   ;;  %v497_v21 = vmov (!%p144_p10), 0.0   ;;  %s344_s5 = sshll.u32 (!%p144_p10), %s167_s4, 3 }
  0x10   : > { %v203_v8 = vand.u32 (!%p144_p10), 127, %v202_v7  ;;  %187 = vst.msk [vmem:[#allocation2] sm:$0x1] (!%p144_p10), %vm186_vm4, %v497_v21  ;;  %v238_v32 = vshrl.u32 (!%p144_p10), %v202_v7, 7  ;;  %s169_s6 = scalar_lea.vmem (!%p144_p10), [#allocation3], %s344_s5  ;;  %s348_s8 = sshll.u32 (!%p144_p10), %s486_s12, 7 }
  0x11   : > { %s260_s7 = sshll.u32 (!%p144_p10), %s169_s6, 4  ;;  %s587_s18 = scalar_lea.hbm (!%p144_p10), %s634_s2, %s348_s8  ;;  %s582_s7 = int_to_ptr.vmem [resolvable:$true] %s260_s7 }
  0x12   : > { %v239_v33 = vsub.s32 (!%p144_p10), 0, %v238_v32  ;;  %s247_s20 = scalar_lea.sflag (!%p144_p10), [#allocation4], %s167_s4 }
  0x16   : > { %s172_s23 = scalar_select %p171_p11, %s486_s12, 1 }
  0x17   : > { %v215_v29 = vld [vmem:[#allocation2] sm:$0x1] }
  0x18   : > { %s345_s24 = sshll.u32 %s172_s23, 3  ;;  %s416_s23 = scalar_lea.vmem %s582_s7, 128 }
  0x19   : > { %s174_s27 = scalar_lea.vmem %s632_s0, %s345_s24  ;;  %s180_s30 = scalar_lea.vmem %s633_s1, %s345_s24 }
  0x1a   : > { %v188_v1 = vld [vmem:[%s174_s27] sm:$0xff]  ;;  %p417_p12 = scmp.ne.s32.totalorder %s582_s7, %s416_s23  ;;  %s498_s24 = smov [#allocation3]  }
  0x1b   : > { %v191_v2 = vsel %vm190_vm0, %v188_v1, -inf  ;;  %v189_v3 = vld [vmem:[%s180_s30] sm:$0xff]  ;;  %s420_s12 = sshll.u32 %s498_s24, 4  ;;  %s421_s12 = int_to_ptr.vmem [resolvable:$false] %s420_s12 }
  0x1c   : > { %192 = vmax.xlane.f32.xlu0 %v191_v2  ;;  %vm213_vm2 = vcmp.ge.s32.totalorder %v189_v3, 0  ;;  %p418_p13 = pnand %p417_p12, %p554_p4  ;;  %s422_s25 = scalar_lea.vmem %s421_s12, 256 }
  0x1d   : > { %p423_p1 = scmp.lt.s32.totalorder %s582_s7, %s421_s12  ;;  %p424_p2 = scmp.lt.s32.totalorder %s422_s25, %s416_s23 }
  0x1e   : > { %p419_p0 = pneg %p418_p13 }
  0x1f   : > { %p425_p3 = por %p424_p2, %p423_p1 }
  0x21   : > { %p426_p5 = pnand %p425_p3, %p419_p0 }
  0x32   : > { %205 = vperm.xlu0 %410, %v189_v3  }
  0xa9   : > { %v193_v4 = vpop.xlane.xlu0 %192 }
  0xaa   : > { %v194_v5 = vsub.f32 %v188_v1, %v193_v4 }
  0xac   : > { %v195_v6 = vmul.f32 1.442695, %v194_v5 }
  0xae   : > { %412 = vpow2.f32 %v195_v6 }
  0xb1   : > { %v206_v9 = vpop.permute.xlu0 %205 }
  0xb2   : > { %vm207_vm1 = vcmp.eq.s32.totalorder %v203_v8, %v206_v9 }
  0xb3   : > { %v208_v12 = vsel %vm207_vm1, %v194_v5, 0.0 }
  0xb4   : > { %v209_v13 = vsel %vm190_vm0, %v208_v12, 0.0 }
  0xb8   : > { %v413_v10 = vpop.eup %412 }
  0xb9   : > { %v197_v11 = vsel %vm190_vm0, %v413_v10, 0.0 }
  0xba   : > { %198 = vadd.xlane.f32.xlu1 %v197_v11 }
  0xbe   : > { %210 = vadd.xlane.f32.xlu1 %v209_v13 }
 0x147   : > { %v199_v14 = vpop.xlane.xlu1 %198 }
 0x148   : > { %414 = vlog2.f32 %v199_v14 }
 0x14b   : > { %v211_v17 = vpop.xlane.xlu1 %210 }
 0x152   : > { %v415_v15 = vpop.eup %414 }
 0x153   : > { %v201_v16 = vmul.f32 0.6931472, %v415_v15 }
 0x155   : > { %v212_v18 = vsub.f32 %v201_v16, %v211_v17 }
 0x157   : > { %v214_v19 = vsel %vm213_vm2, %v212_v18, 0.0 }
 0x158   : > { %v217_v20 = vsel %vm216_vm3, %v214_v19, 0.0 }
 0x159   : > { %218 = vadd.xlane.f32.xlu1 %v217_v20 }
 0x1e6   : > { %v219_v22 = vpop.xlane.xlu1 %218 }
 0x1e7   : > { %v220_v23 = vrot.slane %v219_v22, 4 }
 0x1e9   : > { %v221_v24 = vadd.f32 %v220_v23, %v219_v22 }
 0x1eb   : > { %v222_v25 = vrot.slane %v221_v24, 2 }
 0x1ed   : > { %v223_v26 = vadd.f32 %v222_v25, %v221_v24 }
 0x1ef   : > { %v224_v27 = vrot.slane %v223_v26, 1 }
 0x1f1   : > { %v225_v28 = vadd.f32 %v224_v27, %v223_v26 }
 0x1f3   : > { %351 = vpush %v225_v28 }
 0x224   : > { %s352_s3 = spop %351 }
 0x225   : > { %v227_v30 = vstv %s352_s3 }
 0x226   : > { %v228_v31 = vadd.f32 %v227_v30, %v215_v29 }
 0x228   : > { %230 = vst.msk [vmem:[#allocation2] sm:$0x1] %vm186_vm4, %v228_v31 }
 0x22f   : > { %v234_v34 = vld [vmem:[#allocation2] sm:$0x1] }
 0x230   : > { %v235_v35 = vmul.f32 0.1, %v234_v34 }
 0x232   : > { %v240_v36 = vrot.slane %v235_v35, %v239_v33 }
 0x234   : > { %242 = vperm.xlu1 %411, %v240_v36  }
 0x2b3   : > { %v243_v37 = vpop.permute.xlu1 %242 }
 0x2b4   : > { %245 = vst [vmem:[%s169_s6] sm:$0xff] %v243_v37 }
 0x2b5   : > { %429 = shalt.err (!%p426_p5)
}
 0x2b6   : > { %s430_s26 = scalar_lea.hbm %s587_s18, 128  ;;  %s434_s29 = scalar_lea.hbm %s634_s2, 256 }
 0x2b7   : > { %p431_p6 = scmp.ne.s32.totalorder %s587_s18, %s430_s26  ;;  %p435_p10 = scmp.lt.u32.totalorder %s587_s18, %s634_s2 }
 0x2b8   : > { %p436_p11 = scmp.lt.u32.totalorder %s434_s29, %s430_s26  ;;  %p438_p13 = scmp.lt.u32.totalorder %s430_s26, %s587_s18 }
 0x2b9   : > { %p432_p7 = pnand %p431_p6, %p554_p4 }
 0x2ba   : > { %p437_p12 = por %p436_p11, %p435_p10 }
 0x2bb   : > { %p433_p9 = pneg %p432_p7 }
 0x2bc   : > { %p439_p0 = por %p438_p13, %p437_p12 }
 0x2be   : > { %p440_p1 = pnand %p439_p0, %p433_p9 }
 0x2c0   : > { %443 = shalt.err (!%p440_p1)
}
 0x2c1   : > { %353 = dma.vmem_to_hbm [thread:$0]  (%p554_p4), %s582_s7, 128, %s587_s18, %s247_s20  }
 0x2c2 PF: > { %p359_p2 = scmp.ge.s32.totalorder %s494_s14, 2  ;;  %s272_s4 = sand.u32 1, %s474_s9  }
 0x2c3   : > { %s273_s5 = scalar_lea.sflag [#allocation4], %s272_s4 }
 0x2c4   : > { %p356_p3 = pnand %p359_p2, %p561_p8 }
 0x2c6   : > { %469 = dma.done.wait (!%p356_p3), %s273_s5, 128  }
 0x2c7   : > { %471 = vsyncadd (!%p356_p3), %s273_s5, 4294967168  ;;  %s15_s14 = sadd.s32 1, %s494_s14   ;;  %s637_s9 = smov %s478_s10 }
 0x2c8   : > { %p12_p5 = scmp.ge.s32.totalorder %s15_s14, 4   ;;  %s638_s10 = smov %s482_s11 }
 0x2c9   : > { %s639_s11 = smov %s567_s22  ;;  %s640_s12 = smov %s490_s13 }
 0x2ca   : > { %s641_s13 = smov %s643_s17  ;;  %14 = sbr.rel (!%p12_p5) target bundleno = 4 (0x4), region = 74 }
 0x2d1   :  { %278 = vsyncpa [#allocation4], 1 }
 0x2d2   :  { %280 = vsyncpa [#allocation4 + $0x1], 1 }

</bundles_post_ra>
